<compile_context>
chip_gen: v7x
topology: tpu7x:2x2x1
jax: 0.10.0
libtpu: 0.0.40
codegen_flags: <defaults>
</compile_context>

<pallas_src>
import jax
import jax.numpy as jnp
from jax.experimental import pallas as pl
from jax.experimental.pallas import tpu as pltpu


def _round_up(x, m):
    return ((x + m - 1) // m) * m


def _logreg_kernel(x_ref, wt_ref, b_ref, out_ref):
    # x_ref: (TM, ft_in)  wt_ref: (ft_in, C)  b_ref: (1, C)  out_ref: (TM, C)
    logits = jnp.dot(x_ref[...], wt_ref[...],
                     preferred_element_type=jnp.float32)
    logits = logits + b_ref[...]                        # broadcast (1, C)
    m = jnp.max(logits, axis=-1, keepdims=True)         # XLU lane reduce
    shifted = logits - m
    lse = jnp.log(jnp.sum(jnp.exp(shifted), axis=-1, keepdims=True))
    out_ref[...] = (shifted - lse).astype(out_ref.dtype)


def _choose_block_rows(M, ft_in, nb_classes, x_itemsize):
    """Balanced, sublane-aligned row tiles sized against a VMEM budget."""
    if M <= 8:
        return max(M, 1)                 # single full-dim block
    max_rows = 1024                      # DMA efficiency plateaus ~1-2K rows
    n_blocks = pl.cdiv(M, max_rows)
    if M >= 256:
        n_blocks = max(n_blocks, 2)      # >=2 grid steps -> both v7x TCs
    block_rows = _round_up(pl.cdiv(M, n_blocks), 8)
    block_rows = min(block_rows, (M // 8) * 8)   # keep block <= array rows

    # Conservative VMEM budget (fits v5e 16 MiB scoped default with headroom
    # and v7x's 64 MiB physical): double-buffered x/out blocks + resident W^T.
    budget = 12 * 1024 * 1024
    wt_bytes = 2 * ft_in * nb_classes * 4

    def cost(br):
        return (2 * br * ft_in * x_itemsize      # x blocks (double-buffered)
                + 2 * br * nb_classes * 4        # out blocks (double-buffered)
                + wt_bytes)

    while block_rows > 8 and cost(block_rows) > budget:
        block_rows = max(8, _round_up(block_rows // 2, 8))
    return block_rows


def logreg_forward(seq, weight, bias, *, block_rows=None):
    """log_softmax(seq @ weight.T + bias, axis=-1).

    seq:    (..., ft_in)
    weight: (nb_classes, ft_in)   (PyTorch nn.Linear layout)
    bias:   (nb_classes,)
    """
    *lead, ft_in = seq.shape
    nb_classes = weight.shape[0]

    x = seq.reshape(-1, ft_in)                   # keep caller dtype (bf16 ok)
    M = x.shape[0]

    if block_rows is None:
        block_rows = _choose_block_rows(M, ft_in, nb_classes, x.dtype.itemsize)

    wt = weight.T.astype(x.dtype)                # (ft_in, nb_classes), resident
    b = bias.reshape(1, nb_classes).astype(jnp.float32)

    grid = (pl.cdiv(M, block_rows),)             # partial last block is masked

    out = pl.pallas_call(
        _logreg_kernel,
        out_shape=jax.ShapeDtypeStruct((M, nb_classes), seq.dtype),
        grid_spec=pltpu.PrefetchScalarGridSpec(
            num_scalar_prefetch=0,
            grid=grid,
            in_specs=[
                # x row tile; last dim equals the full array dim (legal).
                pl.BlockSpec((block_rows, ft_in), lambda i: (i, 0)),
                # W^T and bias: same (full-array) block every step -> resident.
                pl.BlockSpec((ft_in, nb_classes), lambda i: (0, 0)),
                pl.BlockSpec((1, nb_classes), lambda i: (0, 0)),
            ],
            # Narrow output block: full class dim, no padded columns, no
            # post-call slice; OOB rows of the boundary block are dropped.
            out_specs=pl.BlockSpec((block_rows, nb_classes), lambda i: (i, 0)),
        ),
        compiler_params=pltpu.CompilerParams(
            dimension_semantics=("parallel",),
            vmem_limit_bytes=32 * 1024 * 1024),
    )(x, wt, b)

    return out.reshape(*lead, nb_classes)


def _reference(seq, weight, bias):
    logits = jnp.einsum('...i,ci->...c', seq, weight) + bias
    return jax.nn.log_softmax(logits, axis=-1)


if __name__ == "__main__":
    # Small shapes consistent with LogReg: batch=2, seq=8 rows, ft_in=32.
    B, S, ft_in, nb_classes = 2, 8, 32, 7

    key = jax.random.PRNGKey(0)
    k_x, k_w = jax.random.split(key, 2)

    seq = jax.random.normal(k_x, (B, S, ft_in), dtype=jnp.float32)

    # nn.Linear(ft_in, nb_classes): weight (nb_classes, ft_in) xavier_uniform,
    # bias zeros (matches LogReg.weights_init).
    bound = (6.0 / (ft_in + nb_classes)) ** 0.5
    weight = jax.random.uniform(k_w, (nb_classes, ft_in), dtype=jnp.float32,
                                minval=-bound, maxval=bound)
    bias = jnp.zeros((nb_classes,), dtype=jnp.float32)

    out = logreg_forward(seq, weight, bias)
    out = jax.block_until_ready(out)

    ref = _reference(seq, weight, bias)
    assert out.shape == (B, S, nb_classes), out.shape
    assert jnp.allclose(out, ref, atol=1e-5, rtol=1e-5), \
        f"max abs err = {jnp.max(jnp.abs(out - ref))}"

    print("KERNEL_OK")
</pallas_src>

<mosaic_0001>
module attributes {stable_mosaic.version = 11 : i64} {
  func.func @_logreg_kernel(%arg0: i32, %arg1: memref<16x32xf32, #tpu.memory_space<vmem>>, %arg2: memref<32x7xf32, #tpu.memory_space<vmem>>, %arg3: memref<1x7xf32, #tpu.memory_space<vmem>>, %arg4: memref<16x7xf32, #tpu.memory_space<vmem>>) attributes {dimension_semantics = [#tpu.dimension_semantics<parallel>], iteration_bounds = array<i64: 1>, scalar_prefetch = 0 : i64, scratch_operands = 0 : i64, tpu.core_type = #tpu.core_type<tc>, window_params = [{transform_indices = @transform_0, window_bounds = array<i64: 16, 32>}, {pipeline_mode = #tpu.pipeline_mode<synchronous>, transform_indices = @transform_1, window_bounds = array<i64: 32, 7>}, {pipeline_mode = #tpu.pipeline_mode<synchronous>, transform_indices = @transform_2, window_bounds = array<i64: 1, 7>}, {transform_indices = @transform_3, window_bounds = array<i64: 16, 7>}]} {
    %c0 = arith.constant 0 : index
    %c0_0 = arith.constant 0 : index
    %0 = vector.load %arg1[%c0, %c0_0] : memref<16x32xf32, #tpu.memory_space<vmem>>, vector<16x32xf32>
    %c0_1 = arith.constant 0 : index
    %c0_2 = arith.constant 0 : index
    %1 = vector.load %arg2[%c0_1, %c0_2] : memref<32x7xf32, #tpu.memory_space<vmem>>, vector<32x7xf32>
    %cst = arith.constant dense<0.000000e+00> : vector<16x7xf32>
    %2 = tpu.matmul %0, %1, %cst {dimension_numbers = #tpu.dot_dimension_numbers<[1], [0], [0], [1], [0, 0, 1, 1], [], []>} : vector<16x32xf32>, vector<32x7xf32>, vector<16x7xf32> -> vector<16x7xf32>
    %c0_3 = arith.constant 0 : index
    %c0_4 = arith.constant 0 : index
    %3 = vector.load %arg3[%c0_3, %c0_4] : memref<1x7xf32, #tpu.memory_space<vmem>>, vector<1x7xf32>
    %4 = vector.broadcast %3 : vector<1x7xf32> to vector<16x7xf32>
    %5 = arith.addf %2, %4 : vector<16x7xf32>
    %cst_5 = arith.constant dense<0xFF800000> : vector<16xf32>
    %6 = vector.multi_reduction <maximumf>, %5, %cst_5 [1] : vector<16x7xf32> to vector<16xf32>
    %7 = vector.shape_cast %6 : vector<16xf32> to vector<16x1xf32>
    %8 = vector.broadcast %7 : vector<16x1xf32> to vector<16x7xf32>
    %9 = arith.subf %5, %8 : vector<16x7xf32>
    %10 = math.exp %9 : vector<16x7xf32>
    %cst_6 = arith.constant dense<0.000000e+00> : vector<16xf32>
    %11 = vector.multi_reduction <add>, %10, %cst_6 [1] : vector<16x7xf32> to vector<16xf32>
    %12 = vector.shape_cast %11 : vector<16xf32> to vector<16x1xf32>
    %13 = math.log %12 : vector<16x1xf32>
    %14 = vector.broadcast %13 : vector<16x1xf32> to vector<16x7xf32>
    %15 = arith.subf %9, %14 : vector<16x7xf32>
    %c0_7 = arith.constant 0 : index
    %c0_8 = arith.constant 0 : index
    %16 = vector.load %arg4[%c0_7, %c0_8] : memref<16x7xf32, #tpu.memory_space<vmem>>, vector<16x7xf32>
    tpu.vector_store %arg4[%c0_7, %c0_8], %15 {strides = array<i32>} : memref<16x7xf32, #tpu.memory_space<vmem>>, vector<16x7xf32>,
    return
  }
  func.func @transform_0(%arg0: i32) -> (i32, i32) {
    %c0_i32 = arith.constant 0 : i32
    %c0_i32_0 = arith.constant 0 : i32
    return %arg0, %c0_i32 : i32, i32
  }
  func.func @transform_1(%arg0: i32) -> (i32, i32) {
    %c0_i32 = arith.constant 0 : i32
    %c0_i32_0 = arith.constant 0 : i32
    %c0_i32_1 = arith.constant 0 : i32
    return %c0_i32, %c0_i32_0 : i32, i32
  }
  func.func @transform_2(%arg0: i32) -> (i32, i32) {
    %c0_i32 = arith.constant 0 : i32
    %c0_i32_0 = arith.constant 0 : i32
    %c0_i32_1 = arith.constant 0 : i32
    return %c0_i32, %c0_i32_0 : i32, i32
  }
  func.func @transform_3(%arg0: i32) -> (i32, i32) {
    %c0_i32 = arith.constant 0 : i32
    %c0_i32_0 = arith.constant 0 : i32
    return %arg0, %c0_i32 : i32, i32
  }
}

</mosaic_0001>

<bundles_post_ra>
// kernel: tpu_custom_call.1
= control target key start
LH: loop header
LB: loop body
LE: loop exit
PB: predicated region body
PF: predicated region fallthrough
CT: control target
= control target key end

     0   :  { %vm27_vm0 = vcmask 261120   ;;  %vm109_vm1 = vcmask 56320   ;;  %s229_s1 = inlined_call_operand.vmem [shape: f32[32,7], index: 1, kind: input, shape index: {}]   ;;  %s230_s0 = inlined_call_operand.vmem [shape: f32[16,32], index: 0, kind: input, shape index: {}]   ;;  %s231_s2 = inlined_call_operand.vmem [shape: f32[1,7], index: 2, kind: input, shape index: {}]   ;;  %s232_s3 = inlined_call_operand.vmem [shape: f32[16,7], index: 3, kind: output, shape index: {}]  }
   0x1   :  { %v16_v0 = vld [vmem:[%s229_s1] sm:$0xff]  ;;  %v17_v1 = vld [vmem:[%s229_s1 + $0x8] sm:$0xff]  ;;  %v18_v2 = vld [vmem:[%s229_s1 + $0x10] sm:$0xff] }
   0x2   :  { %v160_v3 = vpack.c.bf16 %v17_v1, %v16_v0  ;;  %v19_v4 = vld [vmem:[%s229_s1 + $0x18] sm:$0xff]  ;;  %v14_v5 = vld [vmem:[%s230_s0] sm:$0xff]  ;;  %v15_v7 = vld [vmem:[%s230_s0 + $0x8] sm:$0xff] }
   0x3   :  { %v164_v6 = vpack.c.bf16 %v19_v4, %v18_v2  ;;  %157 = vmatprep.mubr.msk.f32.mxu0 %vm27_vm0, %v14_v5  ;;  %v140_v8 = vld [vmem:[%s231_s2] ss:$0 sm:$0xff] }
   0x4   :  { %161 = vmatprep.subr.bf16.mxu0 %v160_v3 }
   0x5   :  { %163 = vmatpush3.bf16.msra.mxu0 %v160_v3 }
   0x6   :  { %165 = vmatprep.subr.bf16.mxu0 %v164_v6 }
   0x9   :  { %167 = vmatpush3.bf16.msra.mxu0 %v164_v6 }
   0xc   :  { %158 = vmatmul.mubr.msk.f32.vlgmr.msra.gmra.mrb[0].mxu0 %vm27_vm0, %v15_v7 }
  0xdf   :  { %v159_v9 = vpop.f32.mrb[0].mxu0 }
  0xe0   :  { %v100_v10 = vpop.f32.mrb[1].mxu0  ;;  %v106_v12 = vadd.f32 %v159_v9, %v140_v8 }
  0xe1   :  { %v101_v11 = vadd.f32 %v140_v8, %v100_v10 }
  0xe2   :  { %v113_v14 = vsel %vm109_vm1, %v106_v12, -inf }
  0xe3   :  { %v110_v13 = vsel %vm109_vm1, %v101_v11, -inf }
  0xe4   :  { %111 = vmax.xlane.f32.xlu0 %v110_v13 }
  0xe8   :  { %114 = vmax.xlane.f32.xlu0 %v113_v14 }
 0x171   :  { %v112_v15 = vpop.xlane.xlu0 %111 }
 0x172   :  { %v116_v16 = vsub.f32 %v101_v11, %v112_v15 }
 0x174   :  { %v118_v17 = vmul.f32 1.442695, %v116_v16 }
 0x175   :  { %v115_v18 = vpop.xlane.xlu0 %114 }
 0x176   :  { %168 = vpow2.f32 %v118_v17  ;;  %v117_v19 = vsub.f32 %v106_v12, %v115_v18 }
 0x178   :  { %v120_v20 = vmul.f32 1.442695, %v117_v19 }
 0x17a   :  { %170 = vpow2.f32 %v120_v20 }
 0x180   :  { %v169_v21 = vpop.eup %168 }
 0x181   :  { %v122_v22 = vsel %vm109_vm1, %v169_v21, 0.0 }
 0x182   :  { %123 = vadd.xlane.f32.xlu1 %v122_v22 }
 0x184   :  { %v171_v23 = vpop.eup %170 }
 0x185   :  { %v125_v24 = vsel %vm109_vm1, %v171_v23, 0.0 }
 0x186   :  { %126 = vadd.xlane.f32.xlu1 %v125_v24 }
 0x20f   :  { %v124_v25 = vpop.xlane.xlu1 %123 }
 0x210   :  { %172 = vlog2.f32 %v124_v25 }
 0x213   :  { %v127_v26 = vpop.xlane.xlu1 %126 }
 0x214   :  { %174 = vlog2.f32 %v127_v26 }
 0x21a   :  { %v173_v27 = vpop.eup %172 }
 0x21b   :  { %v129_v28 = vmul.f32 0.6931472, %v173_v27 }
 0x21d   :  { %v132_v29 = vsub.f32 %v116_v16, %v129_v28 }
 0x21e   :  { %v175_v30 = vpop.eup %174 }
 0x21f   :  { %134 = vst.msk [vmem:[%s232_s3] sm:$0xff] %vm109_vm1, %v132_v29  ;;  %v131_v31 = vmul.f32 0.6931472, %v175_v30 }
 0x221   :  { %v133_v32 = vsub.f32 %v117_v19, %v131_v31 }
 0x223   :  { %135 = vst.msk [vmem:[%s232_s3 + $0x8] sm:$0xff] %vm109_vm1, %v133_v32 }

</bundles_post_ra>
